<compile_context>
chip_gen: v7x
topology: tpu7x:2x2x1
jax: 0.10.0
libtpu: 0.0.40
codegen_flags: <defaults>
</compile_context>

<pallas_src>
import jax
import jax.numpy as jnp
from jax.experimental import pallas as pl
from jax.experimental.pallas import tpu as pltpu


def _round_up(x, m):
    return ((x + m - 1) // m) * m


def _pad_dim(d):
    """Smallest D_pad >= d that divides 128 (d <= 128) or is a multiple of 128."""
    if d >= 128:
        return _round_up(d, 128)
    p = d
    while 128 % p != 0:
        p += 1
    return p


def _vmem_budget_bytes():
    """Generation-aware VMEM budget (v7x has 64 MiB/TC; v5e/v6e have 128 MiB)."""
    try:
        cap = pltpu.get_tpu_info().vmem_capacity_bytes
    except Exception:
        cap = 64 * 1024 * 1024  # conservative: assume the smallest generation
    return min(cap // 2, 48 * 1024 * 1024)


def _ancestor_sum_kernel(src_ref, out_ref):
    # src_ref: (A_max+1, block_rows, LANE)  lane-dense gathered embeddings
    # out_ref: (block_rows, LANE)           sum over the (leaf + ancestors) axis
    out_ref[...] = jnp.sum(src_ref[...].astype(jnp.float32), axis=0)


def ancestor_sum(slab, *, block_rows, vmem_limit_bytes):
    """slab: (A+1, M, L) -> (M, L) f32 = sum over leading axis (pure VPU adds)."""
    a1, m, l = slab.shape
    assert m % block_rows == 0 and l % 128 == 0 and block_rows % 8 == 0
    return pl.pallas_call(
        _ancestor_sum_kernel,
        grid=(m // block_rows,),
        out_shape=jax.ShapeDtypeStruct((m, l), jnp.float32),
        in_specs=[
            # Full (small) reduction axis leads; last two dims are an
            # (8,128)-aligned, lane-dense tile.  Default Buffered(2) kept.
            pl.BlockSpec((a1, block_rows, l), lambda i: (0, i, 0)),
        ],
        out_specs=pl.BlockSpec((block_rows, l), lambda i: (i, 0)),
        compiler_params=pltpu.CompilerParams(
            dimension_semantics=("parallel",),
            vmem_limit_bytes=vmem_limit_bytes,
        ),
    )(slab)


class SnomedEmbPallas:
    """JAX/Pallas port of SnomedEmb (deterministic synthetic parameters)."""

    def __init__(self, dxVocabSize, dxnumAncestors, dxnumRelations,
                 dxEmbDim, attnDim, key):
        self.dxVocabSize = dxVocabSize
        self.dxnumAncestors = dxnumAncestors
        self.dxnumRelations = dxnumRelations
        self.dxEmbDim = dxEmbDim
        self.attnDim = attnDim
        ks = jax.random.split(key, 10)
        init = lambda k, shape, s=1.0: s * jax.random.normal(k, shape, jnp.float32)
        self.dxEmb = init(ks[0], (dxVocabSize, dxEmbDim))           # nn.Embedding
        self.t = init(ks[1], (1, dxEmbDim))                         # nn.Embedding(1, D)
        self.dxAnEmb = init(ks[2], (dxnumAncestors + 1, dxEmbDim))
        self.dxReEmb = init(ks[3], (dxnumRelations + 1, dxEmbDim))
        # Parameters below exist in the reference module but never influence the
        # value forward() returns (attention path is dead code).
        self.attn_w = init(ks[4], (2 * dxEmbDim, attnDim), 0.1)
        self.attn_b = init(ks[5], (1, attnDim), 0.1)
        self.attnCombine_w = init(ks[6], (attnDim, 1), 0.1)
        self.attnCombine_b = init(ks[7], (1, 1), 0.1)
        self.anW_w = init(ks[8], (dxEmbDim, dxEmbDim), 0.1)
        self.anW_b = init(ks[9], (1, dxEmbDim), 0.1)

    def forward(self, ontoInput, slab_dtype=jnp.float32):
        # The tuple's dxEmb and relationList are unused by the returned value
        # (they only feed the dead attention path).
        _dxEmb, leavesList, ancestorsList, relationList, permute_index = ontoInput
        D = self.dxEmbDim

        groups = [(l, a) for l, a in zip(leavesList, ancestorsList)
                  if l.shape[0] > 0]
        if not groups:
            allEmb = jnp.zeros((1, D), jnp.float32)
            return allEmb[permute_index, :]

        # ---- one (N, A_max+1) index matrix into a combined table ------------
        A_max = max(int(a.shape[1]) for _, a in groups)
        n_anc_rows = self.dxAnEmb.shape[0]            # dxnumAncestors + 1
        zero_idx = n_anc_rows                         # extra all-zeros row
        leaf_off = n_anc_rows + 1                     # dxEmb rows start here

        idx_rows = []
        for leaves, ancestors in groups:
            n, a = ancestors.shape
            anc = ancestors.astype(jnp.int32)
            if a < A_max:
                anc = jnp.concatenate(
                    [anc, jnp.full((n, A_max - a), zero_idx, jnp.int32)], axis=1)
            leaf = leaves[:, :1].astype(jnp.int32) + leaf_off
            idx_rows.append(jnp.concatenate([anc, leaf], axis=1))
        idx = jnp.concatenate(idx_rows, axis=0)       # (N, A_max+1) int32
        N = int(idx.shape[0])

        # ---- combined, zero-padded lookup table ------------------------------
        D_pad = _pad_dim(D)                           # avoid masked-store cliff
        table = jnp.concatenate(
            [self.dxAnEmb, jnp.zeros((1, D), jnp.float32), self.dxEmb], axis=0)
        if D_pad != D:
            table = jnp.pad(table, ((0, 0), (0, D_pad - D)))
        table = table.astype(slab_dtype)

        # ---- lane-folded flat layout + VMEM-budgeted block size --------------
        LANE = D_pad * max(1, 512 // D_pad)           # >=128, usually 512 lanes
        rows_per_krow = LANE // D_pad
        bpe = jnp.dtype(slab_dtype).itemsize
        # double-buffered (A_max+1) input layers + 1 f32 output, per block row
        bytes_per_blockrow = 2 * ((A_max + 1) * bpe + 4) * LANE
        vmem_budget = _vmem_budget_bytes()
        block_rows = int((3 * vmem_budget // 4) // bytes_per_blockrow)
        block_rows = max(8, min(2048, (block_rows // 8) * 8))

        M_min = -(-(N + 1) // rows_per_krow)          # keep >= 1 all-zero pad row
        block_rows = min(block_rows, _round_up(M_min, 8))
        M_fold = _round_up(M_min, block_rows)
        N_pad = M_fold * rows_per_krow

        if N_pad > N:                                 # pad rows gather exact zeros
            idx = jnp.concatenate(
                [idx, jnp.full((N_pad - N, A_max + 1), zero_idx, jnp.int32)],
                axis=0)

        # XLA gather of all (leaf + ancestor) rows; the reshape into the
        # lane-folded (A+1, M_fold, LANE) slab is contiguous and free.
        slab = table[idx.T].reshape(A_max + 1, M_fold, LANE)

        packed = ancestor_sum(slab, block_rows=block_rows,
                              vmem_limit_bytes=vmem_budget)

        # Single fused take: pad rows are exact zeros, so row index N (the
        # reference's appended zero row) and the D_pad > D column padding both
        # fall out in one gather/slice — no extra passes over the output.
        out2d = packed.reshape(N_pad, D_pad)
        return out2d[permute_index, :D]


if __name__ == "__main__":
    key = jax.random.PRNGKey(0)
    D, K = 32, 16
    vocab, n_anc, n_rel = 20, 10, 6
    k_model, k1, k2, k3, k4, k5, k6, kp = jax.random.split(key, 8)
    model = SnomedEmbPallas(vocab, n_anc, n_rel, D, K, k_model)

    # Two SNOMED groups with different (rows, ancestors-per-row) shapes.
    leaves1 = jax.random.randint(k1, (8, 4), 0, vocab, dtype=jnp.int32)
    anc1 = jax.random.randint(k2, (8, 4), 0, n_anc + 1, dtype=jnp.int32)
    rel1 = jax.random.randint(k3, (8, 4), 0, n_rel + 1, dtype=jnp.int32)
    leaves2 = jax.random.randint(k4, (6, 3), 0, vocab, dtype=jnp.int32)
    anc2 = jax.random.randint(k5, (6, 3), 0, n_anc + 1, dtype=jnp.int32)
    rel2 = jax.random.randint(k6, (6, 3), 0, n_rel + 1, dtype=jnp.int32)
    total_rows = 8 + 6 + 1
    permute_index = jax.random.permutation(kp, total_rows)

    ontoInput = (model.dxEmb, [leaves1, leaves2], [anc1, anc2], [rel1, rel2],
                 permute_index)
    out = model.forward(ontoInput)
    out = jax.block_until_ready(out)

    # Pure-JAX reference: sum(ancestorsEmb, dim=1) = sum(dxAnEmb[anc]) + leaf[0] emb
    def ref_group(leaves, anc):
        lE = model.dxEmb[leaves]
        aE = model.dxAnEmb[anc]
        return jnp.sum(aE, axis=1) + lE[:, 0, :]

    ref = jnp.concatenate([ref_group(leaves1, anc1),
                           ref_group(leaves2, anc2),
                           jnp.zeros((1, D), jnp.float32)], axis=0)[permute_index]

    assert out.shape == (total_rows, D) and out.dtype == jnp.float32
    assert jnp.allclose(out, ref, atol=1e-5), "Pallas output mismatch vs reference"
    print("KERNEL_OK")
</pallas_src>

<mosaic_0001>
module attributes {stable_mosaic.version = 11 : i64} {
  func.func @_ancestor_sum_kernel(%arg0: i32, %arg1: memref<5x8x512xf32, #tpu.memory_space<vmem>>, %arg2: memref<8x512xf32, #tpu.memory_space<vmem>>) attributes {dimension_semantics = [#tpu.dimension_semantics<parallel>], iteration_bounds = array<i64: 1>, scalar_prefetch = 0 : i64, scratch_operands = 0 : i64, tpu.core_type = #tpu.core_type<tc>, window_params = [{transform_indices = @transform_0, window_bounds = array<i64: 5, 8, 512>}, {transform_indices = @transform_1, window_bounds = array<i64: 8, 512>}]} {
    %c0 = arith.constant 0 : index
    %c0_0 = arith.constant 0 : index
    %c0_1 = arith.constant 0 : index
    %0 = vector.load %arg1[%c0, %c0_0, %c0_1] : memref<5x8x512xf32, #tpu.memory_space<vmem>>, vector<5x8x512xf32>
    %cst = arith.constant dense<0.000000e+00> : vector<8x512xf32>
    %1 = vector.multi_reduction <add>, %0, %cst [0] : vector<5x8x512xf32> to vector<8x512xf32>
    %c0_2 = arith.constant 0 : index
    %c0_3 = arith.constant 0 : index
    %2 = vector.load %arg2[%c0_2, %c0_3] : memref<8x512xf32, #tpu.memory_space<vmem>>, vector<8x512xf32>
    tpu.vector_store %arg2[%c0_2, %c0_3], %1 {strides = array<i32>} : memref<8x512xf32, #tpu.memory_space<vmem>>, vector<8x512xf32>,
    return
  }
  func.func @transform_0(%arg0: i32) -> (i32, i32, i32) {
    %c0_i32 = arith.constant 0 : i32
    %c0_i32_0 = arith.constant 0 : i32
    %c0_i32_1 = arith.constant 0 : i32
    return %c0_i32, %arg0, %c0_i32_0 : i32, i32, i32
  }
  func.func @transform_1(%arg0: i32) -> (i32, i32) {
    %c0_i32 = arith.constant 0 : i32
    %c0_i32_0 = arith.constant 0 : i32
    return %arg0, %c0_i32 : i32, i32
  }
}

</mosaic_0001>

<bundles_post_ra>
// kernel: tpu_custom_call.1
= control target key start
LH: loop header
LB: loop body
LE: loop exit
PB: predicated region body
PF: predicated region fallthrough
CT: control target
= control target key end

     0   :  { %6 = vsyncpa [#allocation3], 0  ;;  %s168_s0 = inlined_call_operand.hbm [shape: f32[5,8,512], index: 0, kind: input, shape index: {}]   ;;  %s169_s1 = inlined_call_operand.hbm [shape: f32[8,512], index: 1, kind: output, shape index: {}]  }
   0x1   :  { %7 = vsyncpa [#allocation4], 0  ;;  %s130_s6 = smov [#allocation2]   ;;  %s82_s10 = scalar_lea.hbm %s168_s0, 2560 }
   0x2   :  { %s13_s7 = sshll.u32 %s130_s6, 4  ;;  %p83_p0 = scmp.ne.s32.totalorder %s168_s0, %s82_s10  ;;  %s14_s7 = int_to_ptr.vmem [resolvable:$true] %s13_s7 }
   0x3   :  { %p86_p1 = scmp.lt.u32.totalorder %s82_s10, %s168_s0 }
   0x5   :  { %p88_p2 = pnand %p86_p1, %p83_p0 }
   0x7   :  { %91 = shalt.err (!%p88_p2)
}
   0x8   :  { %s92_s15 = scalar_lea.vmem %s14_s7, 2560  ;;  %p97_p4 = scmp.lt.s32.totalorder %s14_s7, %s14_s7 }
   0x9   :  { %p93_p3 = scmp.ne.s32.totalorder %s14_s7, %s92_s15  ;;  %p98_p5 = scmp.lt.s32.totalorder %s92_s15, %s92_s15 }
   0xb   :  { %p99_p6 = por %p98_p5, %p97_p4 }
   0xd   :  { %p100_p7 = pnand %p99_p6, %p93_p3 }
   0xf   :  { %103 = shalt.err (!%p100_p7)
}
  0x10   :  { %s131_s16 = smov 512   ;;  %s132_s17 = smov 32  }
  0x11   :  { %19 = dma.hbm_to_vmem [thread:$0]  %s168_s0, 2560, %s14_s7, [#allocation3], %s131_s16, %s131_s16, %s132_s17  }
  0x12   :  { %126 = dma.done.wait [#allocation3], 2560  }
  0x13   :  { %127 = vsyncadd [#allocation3], 4294964736  ;;  %v23_v0 = vld [vmem:[#allocation2] sm:$0xff]  ;;  %v24_v4 = vld [vmem:[#allocation2 + $0x8] sm:$0xff]  ;;  %s133_s0 = smov [#allocation5]  }
  0x14   :  { %v27_v1 = vld [vmem:[#allocation2 + $0x20] sm:$0xff]  ;;  %v28_v6 = vld [vmem:[#allocation2 + $0x28] sm:$0xff]  ;;  %v25_v11 = vld [vmem:[#allocation2 + $0x10] sm:$0xff]  ;;  %s69_s20 = sshll.u32 %s133_s0, 4  ;;  %s70_s20 = int_to_ptr.vmem [resolvable:$true] %s69_s20 }
  0x15   :  { %v31_v2 = vld [vmem:[#allocation2 + $0x40] sm:$0xff]  ;;  %v43_v3 = vadd.f32 %v27_v1, %v23_v0  ;;  %v32_v7 = vld [vmem:[#allocation2 + $0x48] sm:$0xff]  ;;  %v47_v10 = vadd.f32 %v28_v6, %v24_v4  ;;  %v29_v12 = vld [vmem:[#allocation2 + $0x30] sm:$0xff]  ;;  %s104_s21 = scalar_lea.vmem %s70_s20, 512  ;;  %p109_p9 = scmp.lt.s32.totalorder %s70_s20, %s70_s20 }
  0x16   :  { %v35_v5 = vld [vmem:[#allocation2 + $0x60] sm:$0xff]  ;;  %v36_v13 = vld [vmem:[#allocation2 + $0x68] sm:$0xff]  ;;  %v33_v14 = vld [vmem:[#allocation2 + $0x50] sm:$0xff]  ;;  %v51_v16 = vadd.f32 %v29_v12, %v25_v11  ;;  %p105_p8 = scmp.ne.s32.totalorder %s70_s20, %s104_s21  ;;  %p110_p10 = scmp.lt.s32.totalorder %s104_s21, %s104_s21 }
  0x17   :  { %v39_v8 = vld [vmem:[#allocation2 + $0x80] sm:$0xff]  ;;  %v44_v9 = vadd.f32 %v43_v3, %v31_v2  ;;  %v37_v15 = vld [vmem:[#allocation2 + $0x70] sm:$0xff]  ;;  %v48_v18 = vadd.f32 %v47_v10, %v32_v7  ;;  %v26_v19 = vld [vmem:[#allocation2 + $0x18] sm:$0xff] }
  0x18   :  { %v30_v20 = vld [vmem:[#allocation2 + $0x38] sm:$0xff]  ;;  %v40_v22 = vld [vmem:[#allocation2 + $0x88] sm:$0xff]  ;;  %v52_v23 = vadd.f32 %v51_v16, %v33_v14  ;;  %v41_v27 = vld [vmem:[#allocation2 + $0x90] sm:$0xff]  ;;  %p111_p11 = por %p110_p10, %p109_p9 }
  0x19   :  { %v45_v17 = vadd.f32 %v44_v9, %v35_v5  ;;  %v34_v21 = vld [vmem:[#allocation2 + $0x58] sm:$0xff]  ;;  %v55_v24 = vadd.f32 %v30_v20, %v26_v19  ;;  %v49_v26 = vadd.f32 %v48_v18, %v36_v13 }
  0x1a   :  { %v38_v28 = vld [vmem:[#allocation2 + $0x78] sm:$0xff]  ;;  %v53_v29 = vadd.f32 %v52_v23, %v37_v15  ;;  %p112_p12 = pnand %p111_p11, %p105_p8 }
  0x1b   :  { %v46_v25 = vadd.f32 %v45_v17, %v39_v8  ;;  %v56_v30 = vadd.f32 %v55_v24, %v34_v21  ;;  %v50_v31 = vadd.f32 %v49_v26, %v40_v22  ;;  %v42_v32 = vld [vmem:[#allocation2 + $0x98] sm:$0xff] }
  0x1c   :  { %v54_v33 = vadd.f32 %v53_v29, %v41_v27 }
  0x1d   :  { %59 = vst [vmem:[#allocation5] sm:$0xff] %v46_v25  ;;  %v57_v34 = vadd.f32 %v56_v30, %v38_v28  ;;  %60 = vst [vmem:[#allocation5 + $0x8] sm:$0xff] %v50_v31 }
  0x1e   :  { %61 = vst [vmem:[#allocation5 + $0x10] sm:$0xff] %v54_v33 }
  0x1f   :  { %v58_v35 = vadd.f32 %v57_v34, %v42_v32 }
  0x21   :  { %62 = vst [vmem:[#allocation5 + $0x18] sm:$0xff] %v58_v35 }
  0x22   :  { %115 = shalt.err (!%p112_p12)
}
  0x23   :  { %s116_s24 = scalar_lea.hbm %s169_s1, 512 }
  0x24   :  { %p117_p13 = scmp.ne.s32.totalorder %s169_s1, %s116_s24  ;;  %p120_p0 = scmp.lt.u32.totalorder %s116_s24, %s169_s1 }
  0x26   :  { %p122_p1 = pnand %p120_p0, %p117_p13 }
  0x28   :  { %125 = shalt.err (!%p122_p1)
}
  0x29   :  { %72 = dma.vmem_to_hbm [thread:$0]  %s70_s20, 512, %s169_s1, [#allocation4]  }
  0x2a   :  { %128 = dma.done.wait [#allocation4], 512  }
  0x2b   :  { %129 = vsyncadd [#allocation4], 4294966784 }
  0x2c   :  { %76 = vsyncpa [#allocation3], 1 }
  0x2d   :  { %77 = vsyncpa [#allocation4], 1 }

</bundles_post_ra>
